<compile_context>
chip_gen: v5e
topology: v5e:2x2
jax: 0.10.0
libtpu: 0.0.40
codegen_flags: <defaults>
</compile_context>

<pallas_src>
import functools
import math

import jax
import jax.numpy as jnp
from jax.experimental import pallas as pl
from jax.experimental.pallas import tpu as pltpu

TM = 512                         # max M-tile rows for the im2col GEMM kernel
BR = 1024                        # row tile for the fused blend/refine kernel
VMEM_LIMIT = 32 * 1024 * 1024    # explicit scoped-VMEM budget (safe on v5e/v6e/v7x)


def _round_up(x, m):
    return (x + m - 1) // m * m


def _pad_cols(n):
    # Narrow outputs (lastconv, final conv) stay narrow (8-aligned) to avoid
    # writing padded zeros to HBM; real widths stay 128-aligned (lane dense).
    return _round_up(n, 8) if n < 128 else _round_up(n, 128)


# ---------------------------------------------------------------------------
# Pallas kernel 1: fused  (im2col patches @ W) + bias  (+ PReLU | sigmoid)
#   bf16 operands on the MXU, f32 accumulate + epilogue, bf16 store.
# ---------------------------------------------------------------------------
def _mm_bias_act_kernel(a_ref, w_ref, b_ref, al_ref, o_ref, *, act):
    acc = jnp.dot(a_ref[...], w_ref[...], preferred_element_type=jnp.float32)
    acc = acc + b_ref[...]
    if act == "prelu":
        acc = jnp.where(acc >= 0.0, acc, acc * al_ref[...])
    elif act == "sigmoid":
        acc = jax.nn.sigmoid(acc)
    o_ref[...] = acc.astype(o_ref.dtype)


def matmul_bias_act(a, p, act="none"):
    """a: (M, K) activations; p: packed conv params (bf16 w, f32 b/alpha).
    Returns (M, cout) bf16."""
    M, K = a.shape
    Np = p["w"].shape[1]
    N = p["cout"]
    a = a.astype(jnp.bfloat16)
    tm = min(TM, _round_up(M, 128))
    out = pl.pallas_call(
        functools.partial(_mm_bias_act_kernel, act=act),
        out_shape=jax.ShapeDtypeStruct((M, Np), jnp.bfloat16),
        grid=(pl.cdiv(M, tm),),
        in_specs=[
            pl.BlockSpec((tm, K), lambda i: (i, 0)),
            pl.BlockSpec((K, Np), lambda i: (0, 0)),
            pl.BlockSpec((1, Np), lambda i: (0, 0)),
            pl.BlockSpec((1, Np), lambda i: (0, 0)),
        ],
        out_specs=pl.BlockSpec((tm, Np), lambda i: (i, 0)),
        compiler_params=pltpu.CompilerParams(
            dimension_semantics=("parallel",),
            vmem_limit_bytes=VMEM_LIMIT),
    )(a, p["w"], p["b"], p["a"])
    if Np != N:
        out = out[:, :N]
    return out


# ---------------------------------------------------------------------------
# Pallas kernel 2: fused sigmoid-mask blend + Unet residual + clamp  (tiled)
#   merged = w0*sigmoid(m) + w1*(1-sigmoid(m));  out = clip(merged + 2*res - 1, 0, 1)
# ---------------------------------------------------------------------------
def _blend_kernel(w0_ref, w1_ref, m_ref, r_ref, o_ref):
    s = jax.nn.sigmoid(m_ref[...].astype(jnp.float32))     # (br, 1) -> broadcast over C
    w0 = w0_ref[...].astype(jnp.float32)
    w1 = w1_ref[...].astype(jnp.float32)
    res = r_ref[...].astype(jnp.float32)
    merged = w0 * s + w1 * (1.0 - s)
    o_ref[...] = jnp.clip(merged + res * 2.0 - 1.0, 0.0, 1.0)


def blend_refine(warped0, warped1, mask, res):
    """All NHWC; mask has 1 channel (broadcast inside the kernel)."""
    N, H, W, C = warped0.shape
    rows = N * H * W
    br = min(BR, _round_up(rows, 16))
    out = pl.pallas_call(
        _blend_kernel,
        out_shape=jax.ShapeDtypeStruct((rows, C), jnp.float32),
        grid=(pl.cdiv(rows, br),),
        in_specs=[
            pl.BlockSpec((br, C), lambda i: (i, 0)),
            pl.BlockSpec((br, C), lambda i: (i, 0)),
            pl.BlockSpec((br, 1), lambda i: (i, 0)),
            pl.BlockSpec((br, C), lambda i: (i, 0)),
        ],
        out_specs=pl.BlockSpec((br, C), lambda i: (i, 0)),
        compiler_params=pltpu.CompilerParams(dimension_semantics=("parallel",)),
    )(warped0.reshape(rows, C), warped1.reshape(rows, C),
      mask.reshape(rows, 1), res.reshape(rows, C))
    return out.reshape(N, H, W, C)


# ---------------------------------------------------------------------------
# Convolution helpers (im2col in JAX glue, GEMM in the Pallas kernel)
# ---------------------------------------------------------------------------
def _im2col(x, k, stride, pad):
    N, H, W, C = x.shape
    if pad > 0:
        x = jnp.pad(x, ((0, 0), (pad, pad), (pad, pad), (0, 0)))
    Ho = (H + 2 * pad - k) // stride + 1
    Wo = (W + 2 * pad - k) // stride + 1
    cols = []
    for i in range(k):
        for j in range(k):
            cols.append(x[:, i:i + stride * Ho:stride, j:j + stride * Wo:stride, :])
    patches = jnp.concatenate(cols, axis=-1)          # (N, Ho, Wo, k*k*C), (kh, kw, C)
    return patches.reshape(N * Ho * Wo, k * k * C), (N, Ho, Wo)


def conv2d(x, p, *, k=3, stride=1, pad=1, act="prelu"):
    patches, (N, Ho, Wo) = _im2col(x, k, stride, pad)
    out = matmul_bias_act(patches, p, act=act)
    return out.reshape(N, Ho, Wo, -1)


def deconv2d(x, p, act="prelu"):
    """ConvTranspose2d(k=4, stride=2, pad=1) via 4-phase sub-pixel decomposition:
    one 3x3/pad-1 GEMM emitting all four output parities (4*cout columns),
    then a pixel shuffle. Avoids the 4x zero-dilated im2col of the naive form."""
    N, H, W, C = x.shape
    patches, _ = _im2col(x, 3, 1, 1)
    out = matmul_bias_act(patches, p, act=act)        # (N*H*W, 4*cout)
    cout = out.shape[-1] // 4
    out = out.reshape(N, H, W, 2, 2, cout)            # (..., py, px, cout)
    out = out.transpose(0, 1, 3, 2, 4, 5).reshape(N, 2 * H, 2 * W, cout)
    return out


# ---------------------------------------------------------------------------
# Resize / warp (plain JAX glue; data-dependent gathers)
# ---------------------------------------------------------------------------
def interpolate(x, size):
    """Bilinear NHWC resize, align_corners=False (F.interpolate semantics)."""
    N, H, W, C = x.shape
    Ho, Wo = size
    if (Ho, Wo) == (H, W):
        return x
    sy, sx = H / Ho, W / Wo
    gy = jnp.clip((jnp.arange(Ho, dtype=jnp.float32) + 0.5) * sy - 0.5, 0.0, H - 1)
    gx = jnp.clip((jnp.arange(Wo, dtype=jnp.float32) + 0.5) * sx - 0.5, 0.0, W - 1)
    y0 = jnp.floor(gy).astype(jnp.int32); y1 = jnp.minimum(y0 + 1, H - 1)
    x0 = jnp.floor(gx).astype(jnp.int32); x1 = jnp.minimum(x0 + 1, W - 1)
    wy = (gy - y0)[None, :, None, None]
    wx = (gx - x0)[None, None, :, None]
    Ia = x[:, y0][:, :, x0]; Ib = x[:, y0][:, :, x1]
    Ic = x[:, y1][:, :, x0]; Id = x[:, y1][:, :, x1]
    top = Ia * (1 - wx) + Ib * wx
    bot = Ic * (1 - wx) + Id * wx
    return (top * (1 - wy) + bot * wy).astype(x.dtype)


def warp(x, flow):
    """Backward warp NHWC image by per-pixel flow (x-disp, y-disp) in pixels.
    Matches RIFE's grid_sample(align_corners=True, padding_mode='border')."""
    N, H, W, C = x.shape
    gx = jnp.arange(W, dtype=jnp.float32)[None, None, :] + flow[..., 0]
    gy = jnp.arange(H, dtype=jnp.float32)[None, :, None] + flow[..., 1]
    gx = jnp.clip(gx, 0.0, W - 1)
    gy = jnp.clip(gy, 0.0, H - 1)
    x0 = jnp.floor(gx).astype(jnp.int32); x1 = jnp.minimum(x0 + 1, W - 1)
    y0 = jnp.floor(gy).astype(jnp.int32); y1 = jnp.minimum(y0 + 1, H - 1)
    wx = (gx - x0)[..., None]
    wy = (gy - y0)[..., None]

    def gather(im, yy, xx):
        return im[yy, xx]
    g = jax.vmap(gather)
    Ia = g(x, y0, x0); Ib = g(x, y0, x1); Ic = g(x, y1, x0); Id = g(x, y1, x1)
    top = Ia * (1 - wx) + Ib * wx
    bot = Ic * (1 - wx) + Id * wx
    return (top * (1 - wy) + bot * wy).astype(x.dtype)


# ---------------------------------------------------------------------------
# Parameters (deterministic synthetic init; pre-padded / pre-cast once)
# ---------------------------------------------------------------------------
class PGen:
    def __init__(self, seed=0):
        self.key = jax.random.PRNGKey(seed)

    def normal(self, shape, scale):
        self.key, sub = jax.random.split(self.key)
        return jax.random.normal(sub, shape, jnp.float32) * scale


def _pack_params(w, b, a):
    """Pad + cast once at construction time: bf16 weights, f32 bias / PReLU alpha."""
    K, n = w.shape
    npad = _pad_cols(n)
    wp = jnp.zeros((K, npad), jnp.bfloat16).at[:, :n].set(w.astype(jnp.bfloat16))
    bp = jnp.zeros((1, npad), jnp.float32).at[0, :n].set(b.astype(jnp.float32))
    ap = jnp.zeros((1, npad), jnp.float32).at[0, :n].set(a.astype(jnp.float32))
    return {"w": wp, "b": bp, "a": ap, "cout": n}


def make_conv_params(pg, cin, cout, k=3):
    K = k * k * cin
    w = pg.normal((K, cout), 0.5 / math.sqrt(K))
    b = jnp.zeros((cout,), jnp.float32)
    a = jnp.full((cout,), 0.25, jnp.float32)            # PReLU alpha init
    return _pack_params(w, b, a)


def make_deconv_params(pg, cin, cout):
    """Synthetic ConvTranspose2d(cin, cout, 4, 2, 1) weight, pre-folded into the
    sub-pixel (3*3*cin, 4*cout) GEMM weight consumed by deconv2d."""
    # TODO(synk): real flownet.pkl ConvTranspose weights need the spatial flip /
    #             (C_in, C_out, kh, kw) transpose before this folding.
    K4 = 16 * cin
    w4 = pg.normal((K4, cout), 0.5 / math.sqrt(K4)).reshape(4, 4, cin, cout)
    wm = jnp.zeros((3, 3, cin, 4, cout), jnp.float32)
    for py in range(2):
        for px in range(2):
            ph = 2 * py + px
            for ai in range(2):
                for bi in range(2):
                    kh, kw = 2 * ai + py, 2 * bi + px
                    di, dj = ai + py - 1, bi + px - 1
                    wm = wm.at[di + 1, dj + 1, :, ph, :].set(w4[kh, kw])
    wm = wm.reshape(9 * cin, 4 * cout)
    b = jnp.zeros((4 * cout,), jnp.float32)
    a = jnp.tile(jnp.full((cout,), 0.25, jnp.float32), 4)
    return _pack_params(wm, b, a)


def make_conv2_block(pg, cin, cout):
    return [make_conv_params(pg, cin, cout), make_conv_params(pg, cout, cout)]


def conv2_forward(p, x):
    x = conv2d(x, p[0], stride=2)
    x = conv2d(x, p[1], stride=1)
    return x


def make_ifblock(pg, in_planes, c):
    return {"conv0": [make_conv_params(pg, in_planes, c // 2),
                      make_conv_params(pg, c // 2, c)],
            "convblock": [make_conv_params(pg, c, c) for _ in range(8)],
            "lastconv": make_deconv_params(pg, c, 5)}    # ConvTranspose2d(c,5,4,2,1)


def ifblock_forward(p, x, flow, scale):
    N, H, W, _ = x.shape
    if scale != 1:
        x = interpolate(x, (int(H / scale), int(W / scale)))
    if flow is not None:
        flow = interpolate(flow, (int(H / scale), int(W / scale))) * (1.0 / scale)
        x = jnp.concatenate([x, flow], axis=-1)
    x = conv2d(x, p["conv0"][0], stride=2)
    x = conv2d(x, p["conv0"][1], stride=2)
    feat = x
    # TODO(synk): fuse this 8-conv trunk into one VMEM-resident Pallas kernel
    #             (spatial tile + halo) to avoid 8 activation round-trips to HBM.
    for cp in p["convblock"]:
        feat = conv2d(feat, cp, stride=1)
    x = feat + x
    tmp = deconv2d(x, p["lastconv"], act="none")
    tmp = interpolate(tmp, (H, W))
    return tmp[..., :4] * (scale * 2.0), tmp[..., 4:5]


def make_contextnet(pg, c):
    return [make_conv2_block(pg, 3, c),
            make_conv2_block(pg, c, 2 * c),
            make_conv2_block(pg, 2 * c, 4 * c),
            make_conv2_block(pg, 4 * c, 8 * c)]


def contextnet_forward(p, x, flow):
    feats = []
    for blk in p:
        x = conv2_forward(blk, x)
        flow = interpolate(flow, (x.shape[1], x.shape[2])) * 0.5
        feats.append(warp(x, flow))
    return feats


def make_unet(pg, c):
    return {"down0": make_conv2_block(pg, 17, 2 * c),
            "down1": make_conv2_block(pg, 4 * c, 4 * c),
            "down2": make_conv2_block(pg, 8 * c, 8 * c),
            "down3": make_conv2_block(pg, 16 * c, 16 * c),
            "up0": make_deconv_params(pg, 32 * c, 8 * c),
            "up1": make_deconv_params(pg, 16 * c, 4 * c),
            "up2": make_deconv_params(pg, 8 * c, 2 * c),
            "up3": make_deconv_params(pg, 4 * c, c),
            "conv": make_conv_params(pg, c, 3)}


def unet_forward(p, img0, img1, w0, w1, mask, flow, c0, c1):
    cat = lambda *ts: jnp.concatenate(ts, axis=-1)
    s0 = conv2_forward(p["down0"], cat(img0, img1, w0, w1, mask, flow))
    s1 = conv2_forward(p["down1"], cat(s0, c0[0], c1[0]))
    s2 = conv2_forward(p["down2"], cat(s1, c0[1], c1[1]))
    s3 = conv2_forward(p["down3"], cat(s2, c0[2], c1[2]))
    x = deconv2d(cat(s3, c0[3], c1[3]), p["up0"])
    x = deconv2d(cat(x, s2), p["up1"])
    x = deconv2d(cat(x, s1), p["up2"])
    x = deconv2d(cat(x, s0), p["up3"])
    x = conv2d(x, p["conv"], stride=1, act="sigmoid")   # Conv2d then sigmoid (fused)
    return x


def make_ifnet_params(seed=0):
    pg = PGen(seed)
    c0, c1, c2 = 32, 24, 16      # reduced widths (released RIFE: 240/150/90)
    cu = 8                       # reduced context/unet base width (released: 16)
    return {"block0": make_ifblock(pg, 6, c0),
            "block1": make_ifblock(pg, 13 + 4, c1),
            "block2": make_ifblock(pg, 13 + 4, c2),
            "contextnet": make_contextnet(pg, cu),
            "unet": make_unet(pg, cu)}


def ifnet_forward(params, imgs, scale_list, timestep=0.5):
    # `timestep` accepted but unused: matches the base IFNet student path.
    img0, img1 = imgs[..., :3], imgs[..., 3:6]
    flow_list, mask_list, merged = [], [], []
    warped_img0, warped_img1 = img0, img1
    flow, mask = None, None
    blocks = [params["block0"], params["block1"], params["block2"]]
    for i in range(3):
        if flow is None:
            flow, mask = ifblock_forward(
                blocks[i], jnp.concatenate([img0, img1], -1), None, scale_list[i])
        else:
            x_in = jnp.concatenate([img0, img1, warped_img0, warped_img1, mask], -1)
            flow_d, mask_d = ifblock_forward(blocks[i], x_in, flow, scale_list[i])
            flow = flow + flow_d
            mask = mask + mask_d
        flow_list.append(flow)
        mask_list.append(mask)                 # pre-sigmoid; sigmoid fused downstream
        warped_img0 = warp(img0, flow[..., 0:2])
        warped_img1 = warp(img1, flow[..., 2:4])
        merged.append((warped_img0, warped_img1))

    flow_teacher, merged_teacher, loss_distill = None, None, 0.0   # inference: no gt
    c0 = contextnet_forward(params["contextnet"], img0, flow[..., 0:2])
    c1 = contextnet_forward(params["contextnet"], img1, flow[..., 2:4])
    tmp = unet_forward(params["unet"], img0, img1, warped_img0, warped_img1,
                       mask, flow, c0, c1)
    # merged[2] = clamp(w0*sig(mask) + w1*(1-sig(mask)) + (2*unet - 1), 0, 1)  (Pallas)
    merged2 = blend_refine(merged[2][0], merged[2][1], mask_list[2], tmp)
    merged_out = [None, None, merged2]         # only merged[2] is consumed upstream
    return (flow_list, jax.nn.sigmoid(mask_list[2]), merged_out,
            flow_teacher, merged_teacher, loss_distill)


class RIFEPallas:
    """JAX/Pallas re-implementation of torchDVC RIFE.forward (student path, no TTA)."""

    def __init__(self, seed=0):
        self.params = make_ifnet_params(seed)

    def forward(self, data, prop=None):
        scale = 1
        scale_list = [4.0 / scale, 2.0 / scale, 1.0 / scale]
        timestep = 0.5
        img0 = jnp.transpose(data["x1"], (0, 2, 3, 1)).astype(jnp.bfloat16)  # NCHW->NHWC
        img1 = jnp.transpose(data["x2"], (0, 2, 3, 1)).astype(jnp.bfloat16)
        imgs = jnp.concatenate([img0, img1], axis=-1)
        _flow, _mask, merged, _ft, _mt, _ld = ifnet_forward(
            self.params, imgs, scale_list, timestep=timestep)
        out = jnp.transpose(merged[2], (0, 3, 1, 2))     # NHWC -> NCHW (f32)
        data["bframe/x_hat"] = out
        data["frame_hat"] = out
        data["hframe/likelihood"] = None
        return data


if __name__ == "__main__":
    key = jax.random.PRNGKey(0)
    k1, k2 = jax.random.split(key)
    # H, W = 32 (divisible by 32, as the RIFE wrapper expects for scale_list [4,2,1])
    x1 = jax.random.uniform(k1, (2, 3, 32, 32), jnp.float32)
    x2 = jax.random.uniform(k2, (2, 3, 32, 32), jnp.float32)
    model = RIFEPallas(seed=0)
    data = {"x1": x1, "x2": x2}
    out = model.forward(data, prop=None)
    frame = jax.block_until_ready(out["frame_hat"])
    assert frame.shape == (2, 3, 32, 32)
    assert frame.dtype == jnp.float32
    assert bool(jnp.all(jnp.isfinite(frame)))
    print("KERNEL_OK")
</pallas_src>

<mosaic_0001>
module attributes {stable_mosaic.version = 11 : i64} {
  func.func @_mm_bias_act_kernel(%arg0: i32, %arg1: memref<128x54xbf16, #tpu.memory_space<vmem>>, %arg2: memref<54x16xbf16, #tpu.memory_space<vmem>>, %arg3: memref<1x16xf32, #tpu.memory_space<vmem>>, %arg4: memref<1x16xf32, #tpu.memory_space<vmem>>, %arg5: memref<128x16xbf16, #tpu.memory_space<vmem>>) attributes {dimension_semantics = [#tpu.dimension_semantics<parallel>], iteration_bounds = array<i64: 1>, scalar_prefetch = 0 : i64, scratch_operands = 0 : i64, tpu.core_type = #tpu.core_type<tc>, window_params = [{transform_indices = @transform_0, window_bounds = array<i64: 128, 54>}, {pipeline_mode = #tpu.pipeline_mode<synchronous>, transform_indices = @transform_1, window_bounds = array<i64: 54, 16>}, {pipeline_mode = #tpu.pipeline_mode<synchronous>, transform_indices = @transform_2, window_bounds = array<i64: 1, 16>}, {pipeline_mode = #tpu.pipeline_mode<synchronous>, transform_indices = @transform_3, window_bounds = array<i64: 1, 16>}, {transform_indices = @transform_4, window_bounds = array<i64: 128, 16>}]} {
    %c0 = arith.constant 0 : index
    %c0_0 = arith.constant 0 : index
    %0 = vector.load %arg1[%c0, %c0_0] : memref<128x54xbf16, #tpu.memory_space<vmem>>, vector<128x54xbf16>
    %c0_1 = arith.constant 0 : index
    %c0_2 = arith.constant 0 : index
    %1 = vector.load %arg2[%c0_1, %c0_2] : memref<54x16xbf16, #tpu.memory_space<vmem>>, vector<54x16xbf16>
    %cst = arith.constant dense<0.000000e+00> : vector<128x16xf32>
    %2 = tpu.matmul %0, %1, %cst {dimension_numbers = #tpu.dot_dimension_numbers<[1], [0], [0], [1], [0, 0, 1, 1], [], []>} : vector<128x54xbf16>, vector<54x16xbf16>, vector<128x16xf32> -> vector<128x16xf32>
    %c0_3 = arith.constant 0 : index
    %c0_4 = arith.constant 0 : index
    %3 = vector.load %arg3[%c0_3, %c0_4] : memref<1x16xf32, #tpu.memory_space<vmem>>, vector<1x16xf32>
    %4 = vector.broadcast %3 : vector<1x16xf32> to vector<128x16xf32>
    %5 = arith.addf %2, %4 : vector<128x16xf32>
    %cst_5 = arith.constant 0.000000e+00 : f32
    %6 = vector.broadcast %cst_5 : f32 to vector<128x16xf32>
    %7 = arith.cmpf oge, %5, %6 : vector<128x16xf32>
    %c0_6 = arith.constant 0 : index
    %c0_7 = arith.constant 0 : index
    %8 = vector.load %arg4[%c0_6, %c0_7] : memref<1x16xf32, #tpu.memory_space<vmem>>, vector<1x16xf32>
    %9 = vector.broadcast %8 : vector<1x16xf32> to vector<128x16xf32>
    %10 = arith.mulf %5, %9 : vector<128x16xf32>
    %11 = arith.select %7, %5, %10 : vector<128x16xi1>, vector<128x16xf32>
    %12 = arith.truncf %11 : vector<128x16xf32> to vector<128x16xbf16>
    %c0_8 = arith.constant 0 : index
    %c0_9 = arith.constant 0 : index
    %13 = vector.load %arg5[%c0_8, %c0_9] : memref<128x16xbf16, #tpu.memory_space<vmem>>, vector<128x16xbf16>
    tpu.vector_store %arg5[%c0_8, %c0_9], %12 {strides = array<i32>} : memref<128x16xbf16, #tpu.memory_space<vmem>>, vector<128x16xbf16>,
    return
  }
  func.func @transform_0(%arg0: i32) -> (i32, i32) {
    %c0_i32 = arith.constant 0 : i32
    %c0_i32_0 = arith.constant 0 : i32
    return %arg0, %c0_i32 : i32, i32
  }
  func.func @transform_1(%arg0: i32) -> (i32, i32) {
    %c0_i32 = arith.constant 0 : i32
    %c0_i32_0 = arith.constant 0 : i32
    %c0_i32_1 = arith.constant 0 : i32
    return %c0_i32, %c0_i32_0 : i32, i32
  }
  func.func @transform_2(%arg0: i32) -> (i32, i32) {
    %c0_i32 = arith.constant 0 : i32
    %c0_i32_0 = arith.constant 0 : i32
    %c0_i32_1 = arith.constant 0 : i32
    return %c0_i32, %c0_i32_0 : i32, i32
  }
  func.func @transform_3(%arg0: i32) -> (i32, i32) {
    %c0_i32 = arith.constant 0 : i32
    %c0_i32_0 = arith.constant 0 : i32
    %c0_i32_1 = arith.constant 0 : i32
    return %c0_i32, %c0_i32_0 : i32, i32
  }
  func.func @transform_4(%arg0: i32) -> (i32, i32) {
    %c0_i32 = arith.constant 0 : i32
    %c0_i32_0 = arith.constant 0 : i32
    return %arg0, %c0_i32 : i32, i32
  }
}

</mosaic_0001>

<bundles_post_ra>
// kernel: tpu_custom_call.1
= control target key start
LH: loop header
LB: loop body
LE: loop exit
PB: predicated region body
PF: predicated region fallthrough
CT: control target
= control target key end

     0   :  { %vm131_vm0 = vcmask 1042432   ;;  %vm106_vm1 = vcmask 441344   ;;  %vm252_vm3 = vcmask 125952   ;;  %s498_s0 = inlined_call_operand.vmem [shape: bf16[32,54], index: 0, kind: input, shape index: {}]   ;;  %s499_s1 = inlined_call_operand.vmem [shape: bf16[54,16], index: 1, kind: input, shape index: {}]   ;;  %s500_s2 = inlined_call_operand.vmem [shape: f32[1,16], index: 2, kind: input, shape index: {}]   ;;  %s501_s3 = inlined_call_operand.vmem [shape: f32[1,16], index: 3, kind: input, shape index: {}]   ;;  %s502_s4 = inlined_call_operand.vmem [shape: bf16[32,16], index: 4, kind: output, shape index: {}]  }
   0x1   :  { %v40_v0 = vld [vmem:[%s499_s1 + $0x18] sm:$0x7]  ;;  %v392_v4 = vld [vmem:[%s499_s1 + $0x10] sm:$0xff]  ;;  %v391_v5 = vld [vmem:[%s499_s1 + $0x8] sm:$0xff] }
   0x2   :  { %v98_v1 = vunpack.c.l.b16 %v40_v0  ;;  %v390_v6 = vld [vmem:[%s499_s1] sm:$0xff]  ;;  %v384_v8 = vld [vmem:[%s498_s0 + $0x10] sm:$0xff]  ;;  %v383_v11 = vld [vmem:[%s498_s0 + $0x8] sm:$0xff] }
   0x3   :  { %v382_v7 = vld [vmem:[%s498_s0] sm:$0xff]  ;;  %v388_v10 = vld [vmem:[%s498_s0 + $0x30] sm:$0xff]  ;;  %v385_v12 = vld [vmem:[%s498_s0 + $0x18] sm:$0xff] }
   0x4   :  { %v102_v2 = vpack.c.b16 %v98_v1, %v98_v1  ;;  %v386_v9 = vld [vmem:[%s498_s0 + $0x20] sm:$0xff]  ;;  %v387_v13 = vld [vmem:[%s498_s0 + $0x28] sm:$0xff]  ;;  %v389_v14 = vld [vmem:[%s498_s0 + $0x38] sm:$0xff] }
   0x5   :  { %v405_v15 = vld [vmem:[%s500_s2] ss:$0 sm:$0xff] }
   0x6   :  { %v133_v3 = vsel %vm131_vm0, %v102_v2, 0  ;;  %v406_v16 = vld [vmem:[%s501_s3] ss:$0 sm:$0xff] }
   0x7   :  { %139 = vmatpush.bf16.msra.mxu0 %v133_v3  ;;  %393 = vmatpush.bf16.msra.mxu1 %v133_v3 }
   0x8   :  { %394 = vmatpush.bf16.msra.mxu2 %v133_v3  ;;  %395 = vmatpush.bf16.msra.mxu3 %v133_v3 }
   0xb   :  { %140 = vmatpush.bf16.msra.mxu0 %v392_v4  ;;  %396 = vmatpush.bf16.msra.mxu1 %v392_v4 }
   0xc   :  { %397 = vmatpush.bf16.msra.mxu2 %v392_v4  ;;  %398 = vmatpush.bf16.msra.mxu3 %v392_v4 }
   0xf   :  { %141 = vmatpush.bf16.msra.mxu0 %v391_v5  ;;  %399 = vmatpush.bf16.msra.mxu1 %v391_v5 }
  0x10   :  { %400 = vmatpush.bf16.msra.mxu2 %v391_v5  ;;  %401 = vmatpush.bf16.msra.mxu3 %v391_v5 }
  0x13   :  { %142 = vmatpush.bf16.msra.mxu0 %v390_v6  ;;  %402 = vmatpush.bf16.msra.mxu1 %v390_v6 }
  0x14   :  { %403 = vmatpush.bf16.msra.mxu2 %v390_v6  ;;  %404 = vmatpush.bf16.msra.mxu3 %v390_v6 }
  0x16   :  { %374 = vmatmul.msk.bf16.vlgmr.msra.gmra.mxu0 %vm106_vm1, %v382_v7  ;;  %376 = vmatmul.msk.bf16.vlgmr.msra.gmra.mxu1 %vm106_vm1, %v384_v8 }
  0x17   :  { %378 = vmatmul.msk.bf16.vlgmr.msra.gmra.mxu2 %vm106_vm1, %v386_v9  ;;  %380 = vmatmul.msk.bf16.vlgmr.msra.gmra.mxu3 %vm106_vm1, %v388_v10 }
  0x26   :  { %375 = vmatmul.msk.bf16.gmra.mxu0 %vm106_vm1, %v383_v11  ;;  %377 = vmatmul.msk.bf16.gmra.mxu1 %vm106_vm1, %v385_v12 }
  0x27   :  { %379 = vmatmul.msk.bf16.gmra.mxu2 %vm106_vm1, %v387_v13  ;;  %381 = vmatmul.msk.bf16.gmra.mxu3 %vm106_vm1, %v389_v14 }
  0x93   :  { %v144_v17 = vpop.f32.mrf.mxu0  ;;  %v154_v18 = vpop.f32.mrf.mxu1 }
  0x94   :  { %v145_v19 = vadd.f32 %v405_v15, %v144_v17 }
  0x96   :  { %vm184_vm2 = vcmp.ge.f32.partialorder %v145_v19, 0.0  ;;  %v204_v20 = vmul.f32 %v406_v16, %v145_v19 }
  0x98   :  { %v220_v21 = vsel %vm184_vm2, %v145_v19, %v204_v20 }
  0x99   :  { %v236_v22 = vpack.c.bf16 %v220_v21, %v220_v21 }
  0x9a   :  { %v164_v23 = vpop.f32.mrf.mxu2  ;;  %v174_v24 = vpop.f32.mrf.mxu3 }
  0x9b   :  { %253 = vst.msk [vmem:[#allocation2] sm:$0xf] %vm252_vm3, %v236_v22  ;;  %v146_v25 = vpop.f32.mrf.mxu0  ;;  %v156_v26 = vpop.f32.mrf.mxu1 }
  0x9c   :  { %v147_v27 = vadd.f32 %v405_v15, %v146_v25 }
  0x9e   :  { %vm185_vm4 = vcmp.ge.f32.partialorder %v147_v27, 0.0  ;;  %v205_v28 = vmul.f32 %v406_v16, %v147_v27 }
  0xa0   :  { %v221_v29 = vsel %vm185_vm4, %v147_v27, %v205_v28 }
  0xa1   :  { %v237_v30 = vpack.c.bf16 %v221_v29, %v221_v29 }
  0xa2   :  { %v287_v31 = vld [vmem:[#allocation2] sm:$0xf]  ;;  %v166_v32 = vpop.f32.mrf.mxu2  ;;  %v176_v33 = vpop.f32.mrf.mxu3 }
  0xa3   :  { %288 = vst [vmem:[%s502_s4] sm:$0xf] %v287_v31  ;;  %v149_v34 = vpop.f32.mrf.mxu0  ;;  %v159_v35 = vpop.f32.mrf.mxu1 }
  0xa4   :  { %v150_v36 = vadd.f32 %v405_v15, %v149_v34  ;;  %254 = vst.msk [vmem:[#allocation2 + $0x4] sm:$0xf] %vm252_vm3, %v237_v30 }
  0xa6   :  { %vm186_vm5 = vcmp.ge.f32.partialorder %v150_v36, 0.0  ;;  %v206_v37 = vmul.f32 %v406_v16, %v150_v36 }
  0xa8   :  { %v222_v38 = vsel %vm186_vm5, %v150_v36, %v206_v37 }
  0xa9   :  { %v238_v39 = vpack.c.bf16 %v222_v38, %v222_v38 }
  0xaa   :  { %v169_v40 = vpop.f32.mrf.mxu2  ;;  %v179_v41 = vpop.f32.mrf.mxu3 }
  0xab   :  { %v151_v42 = vpop.f32.mrf.mxu0  ;;  %v161_v43 = vpop.f32.mrf.mxu1  ;;  %v289_v44 = vld [vmem:[#allocation2 + $0x4] sm:$0xf]  ;;  %255 = vst.msk [vmem:[#allocation2 + $0x8] sm:$0xf] %vm252_vm3, %v238_v39 }
  0xac   :  { %v152_v45 = vadd.f32 %v405_v15, %v151_v42  ;;  %290 = vst [vmem:[%s502_s4 + $0x4] sm:$0xf] %v289_v44 }
  0xae   :  { %vm187_vm6 = vcmp.ge.f32.partialorder %v152_v45, 0.0  ;;  %v207_v46 = vmul.f32 %v406_v16, %v152_v45 }
  0xb0   :  { %v223_v47 = vsel %vm187_vm6, %v152_v45, %v207_v46 }
  0xb1   :  { %v239_v48 = vpack.c.bf16 %v223_v47, %v223_v47 }
  0xb2   :  { %v171_v49 = vpop.f32.mrf.mxu2  ;;  %v181_v50 = vpop.f32.mrf.mxu3  ;;  %v291_v51 = vld [vmem:[#allocation2 + $0x8] sm:$0xf] }
  0xb3   :  { %292 = vst [vmem:[%s502_s4 + $0x8] sm:$0xf] %v291_v51 }
  0xb4   :  { %256 = vst.msk [vmem:[#allocation2 + $0xc] sm:$0xf] %vm252_vm3, %v239_v48 }
  0xbb   :  { %v293_v52 = vld [vmem:[#allocation2 + $0xc] sm:$0xf] }
  0xbc   :  { %294 = vst [vmem:[%s502_s4 + $0xc] sm:$0xf] %v293_v52 }

</bundles_post_ra>
